<compile_context>
chip_gen: v6e
topology: v6e:2x2x1
jax: 0.10.0
libtpu: 0.0.40
codegen_flags: <defaults>
</compile_context>

<pallas_src>
import jax
import jax.numpy as jnp
from jax.experimental import pallas as pl
from jax.experimental.pallas import tpu as pltpu


# --------------------------------------------------------------------------
# Kernels
# --------------------------------------------------------------------------
def _swiglu_kernel_direct(x_ref, w13_ref, w2_ref, o_ref):
    """f32 output: accumulate straight into the resident output block."""
    h = pl.program_id(1)
    th = w2_ref.shape[0]

    @pl.when(h == 0)
    def _():
        o_ref[...] = jnp.zeros_like(o_ref)

    # One wide gate-up matmul: (tm, dim) @ (dim, 2*th) -> (tm, 2*th), f32 acc.
    ab = jnp.dot(x_ref[...], w13_ref[...], preferred_element_type=jnp.float32)
    a = ab[:, :th]                      # gate  (x @ W1 tile)
    b = ab[:, th:]                      # up    (x @ W3 tile)
    g = (a * jax.nn.sigmoid(a)) * b     # silu(a) * b, f32
    o_ref[...] += jnp.dot(g.astype(w2_ref.dtype), w2_ref[...],
                          preferred_element_type=jnp.float32)


def _swiglu_kernel_acc(x_ref, w13_ref, w2_ref, o_ref, acc_ref):
    """Non-f32 output: f32 scratch accumulator, cast at the last hidden tile."""
    h = pl.program_id(1)
    th = w2_ref.shape[0]

    @pl.when(h == 0)
    def _():
        acc_ref[...] = jnp.zeros_like(acc_ref)

    ab = jnp.dot(x_ref[...], w13_ref[...], preferred_element_type=jnp.float32)
    a = ab[:, :th]
    b = ab[:, th:]
    g = (a * jax.nn.sigmoid(a)) * b
    acc_ref[...] += jnp.dot(g.astype(w2_ref.dtype), w2_ref[...],
                            preferred_element_type=jnp.float32)

    @pl.when(h == pl.num_programs(1) - 1)
    def _():
        o_ref[...] = acc_ref[...].astype(o_ref.dtype)


# --------------------------------------------------------------------------
# Host-side helpers
# --------------------------------------------------------------------------
def _round_up(x: int, m: int) -> int:
    return ((x + m - 1) // m) * m


def _tpu_config():
    """Return (device_kind lowercased, per-core VMEM capacity in bytes)."""
    vmem_cap = 64 * 1024 * 1024          # conservative fallback (v7x-sized)
    try:
        vmem_cap = int(pltpu.get_tpu_info().vmem_capacity_bytes)
    except Exception:
        pass
    kind = ""
    try:
        kind = jax.devices()[0].device_kind.lower()
    except Exception:
        pass
    return kind, vmem_cap


def swiglu_ffn(x, w1, w3, w2, *,
               row_tile: int | None = None,
               hidden_tile: int | None = None,
               use_bf16_mxu: bool = True):
    """Fused SwiGLU FFN forward.

    x  : (..., dim)
    w1 : (dim, hidden)      (== torch w1.weight.T)
    w3 : (dim, hidden)      (== torch w3.weight.T)
    w2 : (hidden, dim)      (== torch w2.weight.T)

    use_bf16_mxu: if the model dtype is f32, run the MXU matmuls in bf16 with
    f32 accumulation (large perf win; small, documented precision tradeoff).
    """
    orig_shape = x.shape
    dim = orig_shape[-1]
    hidden = w1.shape[1]
    assert w1.shape == (dim, hidden)
    assert w3.shape == (dim, hidden)
    assert w2.shape == (hidden, dim)

    out_dtype = jnp.promote_types(x.dtype, w1.dtype)

    kind, vmem_cap = _tpu_config()
    is_v6 = "v6" in kind
    is_v7 = "v7" in kind
    num_cores = 2 if is_v7 else 1

    if row_tile is None:
        row_tile = 512 if is_v6 else 256     # v5e/v7x/unknown -> 256
    if hidden_tile is None:
        hidden_tile = 256                    # multiple of 256: full-width MXU on v6e/v7x

    # MXU compute dtype (bf16 operands, f32 accumulation) when model is f32.
    if use_bf16_mxu and out_dtype == jnp.float32:
        compute_dtype = jnp.bfloat16
    else:
        compute_dtype = out_dtype

    x2d = x.reshape(-1, dim).astype(compute_dtype)
    R = x2d.shape[0]

    # ---- hidden tile + zero padding (padded columns/rows contribute 0). ----
    th = min(hidden_tile, _round_up(hidden, 128))
    th = _round_up(th, 128)
    H_pad = _round_up(hidden, th)
    nh = H_pad // th

    w1c = w1.astype(compute_dtype)
    w3c = w3.astype(compute_dtype)
    w2c = w2.astype(compute_dtype)
    if H_pad != hidden:
        pad_h = H_pad - hidden
        w1c = jnp.pad(w1c, ((0, 0), (0, pad_h)))
        w3c = jnp.pad(w3c, ((0, 0), (0, pad_h)))
        w2c = jnp.pad(w2c, ((0, pad_h), (0, 0)))

    # Fused gate-up weight, tile-interleaved so block h of width 2*th is
    # [W1 tile h | W3 tile h].
    w13 = jnp.concatenate(
        [w1c.reshape(dim, nh, th), w3c.reshape(dim, nh, th)], axis=2
    ).reshape(dim, 2 * H_pad)

    # ---- row tile selection. ----
    if R <= row_tile:
        tm = R                                   # full-extent block: always layout-legal
    else:
        tm = max(8, (row_tile // 8) * 8)
    # Keep >= 2 row programs on multi-TensorCore parts so "parallel" can shard.
    if num_cores >= 2 and R >= 256:
        tm = min(tm, _round_up(pl.cdiv(R, 2), 128))

    in_bytes = jnp.dtype(compute_dtype).itemsize
    out_bytes = jnp.dtype(out_dtype).itemsize
    use_acc = out_dtype != jnp.float32

    def _vmem_bytes(tm_, th_):
        b = 2 * tm_ * dim * in_bytes          # x tile (double-buffered)
        b += 2 * dim * (2 * th_) * in_bytes   # fused W1/W3 tile
        b += 2 * th_ * dim * in_bytes         # W2 tile
        b += 2 * tm_ * dim * out_bytes        # output tile
        if use_acc:
            b += tm_ * dim * 4                # f32 scratch accumulator
        return b

    vmem_budget = int(vmem_cap * 0.8)
    while _vmem_bytes(tm, th) > vmem_budget and tm > 128:
        tm = max(128, ((tm // 2) // 128) * 128)
    vmem_limit_bytes = vmem_budget

    grid = (pl.cdiv(R, tm), nh)               # hidden (reduction) axis last

    cost = pl.CostEstimate(
        flops=6 * R * dim * H_pad,
        transcendentals=R * H_pad,
        bytes_accessed=(R * dim * in_bytes          # x
                        + R * dim * out_bytes       # out
                        + pl.cdiv(R, tm) * 3 * dim * H_pad * in_bytes),  # weights re-streamed per row tile
    )

    if use_acc:
        kernel = _swiglu_kernel_acc
        scratch_shapes = [pltpu.VMEM((tm, dim), jnp.float32)]
    else:
        kernel = _swiglu_kernel_direct
        scratch_shapes = []

    out = pl.pallas_call(
        kernel,
        out_shape=jax.ShapeDtypeStruct((R, dim), out_dtype),
        grid_spec=pltpu.PrefetchScalarGridSpec(
            num_scalar_prefetch=0,
            grid=grid,
            in_specs=[
                pl.BlockSpec((tm, dim), lambda i, h: (i, 0)),        # x rows (resident over h)
                pl.BlockSpec((dim, 2 * th), lambda i, h: (0, h)),    # fused [W1|W3] hidden tile
                pl.BlockSpec((th, dim), lambda i, h: (h, 0)),        # W2 hidden tile
            ],
            out_specs=pl.BlockSpec((tm, dim), lambda i, h: (i, 0)),  # lane-dense, resident over h
            scratch_shapes=scratch_shapes,
        ),
        compiler_params=pltpu.CompilerParams(
            dimension_semantics=("parallel", "arbitrary"),
            vmem_limit_bytes=vmem_limit_bytes,
        ),
        cost_estimate=cost,
    )(x2d, w13, w2c)

    # TODO(synk): nn.Dropout in training mode (p > 0) is not implemented;
    # forward here matches p=0.0 / eval (identity), as in the module default.
    return out.reshape(orig_shape[:-1] + (dim,))


def swiglu_reference(x, w1, w3, w2):
    a = jnp.dot(x, w1)
    b = jnp.dot(x, w3)
    return jnp.dot(jax.nn.silu(a) * b, w2)


if __name__ == "__main__":
    key = jax.random.PRNGKey(0)
    batch, seq, dim, hidden_dim = 2, 8, 32, 64

    k1, k2, k3, k4 = jax.random.split(key, 4)
    x = jax.random.normal(k1, (batch, seq, dim), dtype=jnp.float32)
    # Weights stored pre-transposed relative to torch nn.Linear (in, out).
    w1 = jax.random.normal(k2, (dim, hidden_dim), dtype=jnp.float32) * 0.05
    w3 = jax.random.normal(k3, (dim, hidden_dim), dtype=jnp.float32) * 0.05
    w2 = jax.random.normal(k4, (hidden_dim, dim), dtype=jnp.float32) * 0.05

    y = swiglu_ffn(x, w1, w3, w2)
    y = jax.block_until_ready(y)

    y_ref = swiglu_reference(x, w1, w3, w2)
    assert y.shape == x.shape, (y.shape, x.shape)
    # Tolerance accounts for bf16 MXU operands (f32 accumulation).
    assert jnp.allclose(y, y_ref, atol=2e-2, rtol=2e-2), "mismatch vs reference"

    print("KERNEL_OK")
</pallas_src>

<mosaic_0001>
module attributes {stable_mosaic.version = 11 : i64} {
  func.func @_swiglu_kernel_direct(%arg0: i32, %arg1: i32, %arg2: memref<16x32xbf16, #tpu.memory_space<vmem>>, %arg3: memref<32x256xbf16, #tpu.memory_space<vmem>>, %arg4: memref<128x32xbf16, #tpu.memory_space<vmem>>, %arg5: memref<16x32xf32, #tpu.memory_space<vmem>>) attributes {dimension_semantics = [#tpu.dimension_semantics<parallel>, #tpu.dimension_semantics<arbitrary>], iteration_bounds = array<i64: 1, 1>, scalar_prefetch = 0 : i64, scratch_operands = 0 : i64, tpu.core_type = #tpu.core_type<tc>, window_params = [{transform_indices = @transform_0, window_bounds = array<i64: 16, 32>}, {transform_indices = @transform_1, window_bounds = array<i64: 32, 256>}, {transform_indices = @transform_2, window_bounds = array<i64: 128, 32>}, {transform_indices = @transform_3, window_bounds = array<i64: 16, 32>}]} {
    %c0_i32 = arith.constant 0 : i32
    %0 = arith.cmpi eq, %arg1, %c0_i32 : i32
    %1 = arith.extui %0 : i1 to i32
    %c0_i32_0 = arith.constant 0 : i32
    %2 = arith.cmpi ne, %1, %c0_i32_0 : i32
    scf.if %2 {
      %cst_12 = arith.constant 0.000000e+00 : f32
      %21 = vector.broadcast %cst_12 : f32 to vector<16x32xf32>
      %c0_13 = arith.constant 0 : index
      %c0_14 = arith.constant 0 : index
      %22 = vector.load %arg5[%c0_13, %c0_14] : memref<16x32xf32, #tpu.memory_space<vmem>>, vector<16x32xf32>
      tpu.vector_store %arg5[%c0_13, %c0_14], %21 {strides = array<i32>} : memref<16x32xf32, #tpu.memory_space<vmem>>, vector<16x32xf32>,
    } else {
    }
    %c0 = arith.constant 0 : index
    %c0_1 = arith.constant 0 : index
    %3 = vector.load %arg2[%c0, %c0_1] : memref<16x32xbf16, #tpu.memory_space<vmem>>, vector<16x32xbf16>
    %c0_2 = arith.constant 0 : index
    %c0_3 = arith.constant 0 : index
    %4 = vector.load %arg3[%c0_2, %c0_3] : memref<32x256xbf16, #tpu.memory_space<vmem>>, vector<32x256xbf16>
    %cst = arith.constant dense<0.000000e+00> : vector<16x256xf32>
    %5 = tpu.matmul %3, %4, %cst {dimension_numbers = #tpu.dot_dimension_numbers<[1], [0], [0], [1], [0, 0, 1, 1], [], []>} : vector<16x32xbf16>, vector<32x256xbf16>, vector<16x256xf32> -> vector<16x256xf32>
    %6 = vector.extract_strided_slice %5 {offsets = [0, 0], sizes = [16, 128], strides = [1, 1]} : vector<16x256xf32> to vector<16x128xf32>
    %7 = vector.extract_strided_slice %5 {offsets = [0, 128], sizes = [16, 128], strides = [1, 1]} : vector<16x256xf32> to vector<16x128xf32>
    %8 = arith.negf %6 : vector<16x128xf32>
    %9 = math.exp %8 : vector<16x128xf32>
    %cst_4 = arith.constant 1.000000e+00 : f32
    %10 = vector.broadcast %cst_4 : f32 to vector<16x128xf32>
    %11 = arith.addf %10, %9 : vector<16x128xf32>
    %12 = arith.divf %10, %11 : vector<16x128xf32>
    %13 = arith.mulf %6, %12 : vector<16x128xf32>
    %14 = arith.mulf %13, %7 : vector<16x128xf32>
    %c0_5 = arith.constant 0 : index
    %c0_6 = arith.constant 0 : index
    %15 = vector.load %arg5[%c0_5, %c0_6] : memref<16x32xf32, #tpu.memory_space<vmem>>, vector<16x32xf32>
    %16 = arith.truncf %14 : vector<16x128xf32> to vector<16x128xbf16>
    %c0_7 = arith.constant 0 : index
    %c0_8 = arith.constant 0 : index
    %17 = vector.load %arg4[%c0_7, %c0_8] : memref<128x32xbf16, #tpu.memory_space<vmem>>, vector<128x32xbf16>
    %cst_9 = arith.constant dense<0.000000e+00> : vector<16x32xf32>
    %18 = tpu.matmul %16, %17, %cst_9 {dimension_numbers = #tpu.dot_dimension_numbers<[1], [0], [0], [1], [0, 0, 1, 1], [], []>} : vector<16x128xbf16>, vector<128x32xbf16>, vector<16x32xf32> -> vector<16x32xf32>
    %19 = arith.addf %15, %18 : vector<16x32xf32>
    %c0_10 = arith.constant 0 : index
    %c0_11 = arith.constant 0 : index
    %20 = vector.load %arg5[%c0_10, %c0_11] : memref<16x32xf32, #tpu.memory_space<vmem>>, vector<16x32xf32>
    tpu.vector_store %arg5[%c0_10, %c0_11], %19 {strides = array<i32>} : memref<16x32xf32, #tpu.memory_space<vmem>>, vector<16x32xf32>,
    return
  }
  func.func @transform_0(%arg0: i32, %arg1: i32) -> (i32, i32) {
    %c0_i32 = arith.constant 0 : i32
    %c0_i32_0 = arith.constant 0 : i32
    return %arg0, %c0_i32 : i32, i32
  }
  func.func @transform_1(%arg0: i32, %arg1: i32) -> (i32, i32) {
    %c0_i32 = arith.constant 0 : i32
    %c0_i32_0 = arith.constant 0 : i32
    return %c0_i32, %arg1 : i32, i32
  }
  func.func @transform_2(%arg0: i32, %arg1: i32) -> (i32, i32) {
    %c0_i32 = arith.constant 0 : i32
    %c0_i32_0 = arith.constant 0 : i32
    return %arg1, %c0_i32 : i32, i32
  }
  func.func @transform_3(%arg0: i32, %arg1: i32) -> (i32, i32) {
    %c0_i32 = arith.constant 0 : i32
    %c0_i32_0 = arith.constant 0 : i32
    return %arg0, %c0_i32 : i32, i32
  }
}

</mosaic_0001>

<bundles_post_ra>
// kernel: tpu_custom_call.1
= control target key start
LH: loop header
LB: loop body
LE: loop exit
PB: predicated region body
PF: predicated region fallthrough
CT: control target
= control target key end

     0   :  { %v341_v2 = vmov 0   ;;  %vm20_vm0 = vcmask 261120   ;;  %s414_s0 = inlined_call_operand.vmem [shape: bf16[16,32], index: 0, kind: input, shape index: {}]   ;;  %s415_s1 = inlined_call_operand.vmem [shape: bf16[32,256], index: 1, kind: input, shape index: {}]   ;;  %s416_s2 = inlined_call_operand.vmem [shape: bf16[128,32], index: 2, kind: input, shape index: {}]   ;;  %s417_s3 = inlined_call_operand.hbm [shape: f32[16,32], index: 3, kind: output, shape index: {}]  }
   0x1   :  { %v296_v0 = vld [vmem:[%s415_s1 + $0x14] ss:$8 sps:$4 sm:$0xff]   ;;  %v298_v1 = vld [vmem:[%s415_s1 + $0x10] ss:$8 sps:$4 sm:$0xff]   ;;  %90 = vmatprep.mubr.bf16.mxu0 %v341_v2  ;;  %v299_v3 = vld [vmem:[%s415_s1 + $0x4] ss:$8 sps:$4 sm:$0xff]  }
   0x2   :  { %70 = vmatprep.subr.bf16.mxu0 %v296_v0  ;;  %v301_v4 = vld [vmem:[%s415_s1] ss:$8 sps:$4 sm:$0xff]  }
   0x3   :  { %71 = vmatpush1.bf16.msra.mxu0 %v298_v1  ;;  %v302_v5 = vld [vmem:[%s414_s0] sm:$0xff]  }
   0x4   :  { %72 = vmatprep.subr.bf16.mxu0 %v299_v3 }
   0x7   :  { %73 = vmatpush1.bf16.msra.mxu0 %v301_v4 }
   0x8   :  { %8 = vsyncpa [#allocation3], 0  ;;  %v303_v6 = vld [vmem:[%s416_s2 + $0x38] sm:$0xff]   ;;  %v342_v7 = vmov 0.0   ;;  %v304_v8 = vld [vmem:[%s416_s2 + $0x30] sm:$0xff]   ;;  %vm343_vm1 = vmmov 0  }
   0x9   :  { %270 = vmatprep.subr.bf16.mxu1 %v342_v7  ;;  %21 = vst.msk [vmem:[#allocation2] sm:$0xff] %vm20_vm0, %v342_v7  ;;  %22 = vst.msk [vmem:[#allocation2 + $0x8] sm:$0xff] %vm20_vm0, %v342_v7  ;;  %v305_v9 = vld [vmem:[%s416_s2 + $0x28] sm:$0xff]   ;;  %v306_v10 = vld [vmem:[%s416_s2 + $0x20] sm:$0xff]   ;;  %286 = vmatprep.mubr.msk.bf16.mxu1 %vm343_vm1, %v342_v7 }
   0xa   :  { %250 = vmatmul.mubr.msk.bf16.vlgmr.msra.gmra.mxu0 %vm20_vm0, %v302_v5  ;;  %271 = vmatpush3.bf16.msra.mxu1 %v303_v6  ;;  %v307_v11 = vld [vmem:[%s416_s2 + $0x18] sm:$0xff]   ;;  %v308_v12 = vld [vmem:[%s416_s2 + $0x10] sm:$0xff]   ;;  %v309_v13 = vld [vmem:[%s416_s2 + $0x8] sm:$0xff]  }
   0xb   :  { %272 = vmatprep.subr.bf16.mxu1 %v342_v7  ;;  %v310_v14 = vld [vmem:[%s416_s2] sm:$0xff]   ;;  %s344_s2 = smov [#allocation2]  }
   0xc   :  { %s234_s9 = sshll.u32 %s344_s2, 4  ;;  %s235_s9 = int_to_ptr.vmem [resolvable:$true] %s234_s9 }
   0xd   :  { %s319_s10 = scalar_lea.vmem %s235_s9, 256  ;;  %p324_p1 = scmp.lt.s32.totalorder %s235_s9, %s235_s9 }
   0xe   :  { %273 = vmatpush3.bf16.msra.mxu1 %v304_v8  ;;  %p320_p0 = scmp.ne.s32.totalorder %s235_s9, %s319_s10  ;;  %p325_p2 = scmp.lt.s32.totalorder %s319_s10, %s319_s10 }
   0xf   :  { %274 = vmatprep.subr.bf16.mxu1 %v342_v7 }
  0x10   :  { %v117_v32 = vld [vmem:[#allocation2] sm:$0xff]  ;;  %v118_v36 = vld [vmem:[#allocation2 + $0x8] sm:$0xff]  ;;  %p326_p3 = por %p325_p2, %p324_p1 }
  0x12   :  { %275 = vmatpush3.bf16.msra.mxu1 %v305_v9  ;;  %p327_p4 = pnand %p326_p3, %p320_p0 }
  0x13   :  { %276 = vmatprep.subr.bf16.mxu1 %v342_v7 }
  0x16   :  { %277 = vmatpush3.bf16.msra.mxu1 %v306_v10 }
  0x17   :  { %278 = vmatprep.subr.bf16.mxu1 %v342_v7 }
  0x1a   :  { %279 = vmatpush3.bf16.msra.mxu1 %v307_v11 }
  0x1b   :  { %280 = vmatprep.subr.bf16.mxu1 %v342_v7 }
  0x1e   :  { %281 = vmatpush3.bf16.msra.mxu1 %v308_v12 }
  0x1f   :  { %282 = vmatprep.subr.bf16.mxu1 %v342_v7 }
  0x22   :  { %283 = vmatpush3.bf16.msra.mxu1 %v309_v13 }
  0x23   :  { %284 = vmatprep.subr.bf16.mxu1 %v342_v7 }
  0x26   :  { %285 = vmatpush3.bf16.msra.mxu1 %v310_v14 }
  0xca   :  { %v92_v15 = vpop.f32.mrf.mxu0 }
  0xcb   :  { %v251_v16 = vmul.f32 -1.442695, %v92_v15 }
  0xcc   :  { %v94_v17 = vpop.f32.mrf.mxu0 }
  0xcd   :  { %311 = vpow2.f32 %v251_v16 }
  0xce   :  { %v96_v18 = vpop.f32.mrf.mxu0 }
  0xcf   :  { %v252_v19 = vmul.f32 -1.442695, %v96_v18 }
  0xd0   :  { %v98_v28 = vpop.f32.mrf.mxu0 }
  0xd1   :  { %313 = vpow2.f32 %v252_v19 }
  0xda   :  { %v312_v20 = vpop.eup %311 }
  0xdb   :  { %v107_v21 = vadd.f32 1.0, %v312_v20 }
  0xdd   :  { %315 = vrcp.f32 %v107_v21 }
  0xde   :  { %v314_v22 = vpop.eup %313 }
  0xdf   :  { %v108_v23 = vadd.f32 1.0, %v314_v22 }
  0xe1   :  { %317 = vrcp.f32 %v108_v23 }
  0xea   :  { %v316_v24 = vpop.eup %315 }
  0xeb   :  { %v113_v25 = vmul.f32 %v316_v24, %v92_v15 }
  0xed   :  { %v115_v29 = vmul.f32 %v113_v25, %v94_v17 }
  0xee   :  { %v318_v26 = vpop.eup %317 }
  0xef   :  { %v114_v27 = vmul.f32 %v318_v26, %v96_v18 }
  0xf1   :  { %v116_v30 = vmul.f32 %v114_v27, %v98_v28 }
  0xf3   :  { %v119_v31 = vpack.c.bf16 %v116_v30, %v115_v29 }
  0xf5   :  { %287 = vmatmul.mubr.bf16.vlgmr.msra.gmra.mxu1 %v119_v31 }
 0x1b5   :  { %v218_v33 = vpop.f32.mrf.mxu1 }
 0x1b6   :  { %v225_v34 = vadd.f32 %v218_v33, %v117_v32 }
 0x1b7   :  { %v288_v35 = vpop.f32.mrf.mxu1 }
 0x1b8   :  { %227 = vst.msk [vmem:[#allocation2] sm:$0xff] %vm20_vm0, %v225_v34 }
 0x1b9   :  { %v221_v37 = vpop.f32.mrf.mxu1 }
 0x1ba   :  { %v226_v38 = vadd.f32 %v221_v37, %v118_v36 }
 0x1bb   :  { %v289_v39 = vpop.f32.mrf.mxu1 }
 0x1bc   :  { %228 = vst.msk [vmem:[#allocation2 + $0x8] sm:$0xff] %vm20_vm0, %v226_v38 }
 0x1bd   :  { %330 = shalt.err (!%p327_p4)
}
 0x1be   :  { %s345_s11 = smov 128   ;;  %s346_s12 = smov 8  }
 0x1bf   :  { %240 = dma.vmem_to_hbm [thread:$0]  %s235_s9, 256, %s417_s3, [#allocation3], %s345_s11, %s345_s11, %s346_s12  }
 0x1c0   :  { %339 = dma.done.wait [#allocation3], 256  }
 0x1c1   :  { %340 = vsyncadd [#allocation3], 4294967040 }
 0x1c2   :  { %244 = vsyncpa [#allocation3], 1 }

</bundles_post_ra>
